<compile_context>
chip_gen: v7x
topology: tpu7x:2x2x1
jax: 0.10.0
libtpu: 0.0.40
codegen_flags: <defaults>
</compile_context>

<pallas_src>
import functools
import math

import jax
import jax.numpy as jnp
from jax.experimental import pallas as pl
from jax.experimental.pallas import tpu as pltpu


def _round_up(x, m):
    return ((x + m - 1) // m) * m


def _linear_kernel(x_ref, w_ref, b_ref, o_ref, *, mxu_dtype):
    # x_ref: (tm, Kg) input dtype; w_ref: (Kg, Ng) mxu_dtype; b_ref: (1, Ng) f32;
    # o_ref: (tm, Ng) output dtype.
    x = x_ref[...].astype(mxu_dtype)  # VPU cast, hidden under the streaming DMA
    acc = jnp.dot(x, w_ref[...], preferred_element_type=jnp.float32)
    o_ref[...] = (acc + b_ref[...]).astype(o_ref.dtype)


def linear_1x1_conv(x_nhwc, weight, bias=None, *, block_rows=1024,
                    mxu_dtype=jnp.bfloat16):
    """Per-pixel linear layer (== 1x1 conv) on an NHWC tensor.

    x_nhwc: (N, H, W, C_in); weight: (C_in, C_out); bias: (C_out,) or None.
    Returns (N, H, W, C_out) in x_nhwc.dtype.
    """
    N, H, W, C_in = x_nhwc.shape
    C_out = weight.shape[1]
    M = N * H * W
    out_dtype = x_nhwc.dtype
    wdt = jnp.dtype(mxu_dtype) if mxu_dtype is not None else jnp.dtype(out_dtype)
    if bias is None:
        bias = jnp.zeros((C_out,), jnp.float32)

    # --- Lane-dense fold factor G: make the kernel's last dims multiples of 128.
    g = 1
    if C_out % 128 != 0:
        g = 128 // math.gcd(C_out, 128)
    if g > 64 or M % g != 0:
        g = 1  # fall back to the plain (masked-store) layout

    Mg, Kg, Ng = M // g, g * C_in, g * C_out

    # Free row-major reshape; x keeps its native dtype (single HBM pass).
    x2d = x_nhwc.reshape(Mg, Kg)

    w = weight.astype(wdt)
    if g > 1:
        # Block-diagonal weight: folded matmul == g independent per-pixel matmuls.
        #   out[p, j*C_out + d] = sum_c x[p, j*C_in + c] * W[c, d]
        w = jnp.kron(jnp.eye(g, dtype=wdt), w)          # (Kg, Ng), tiny
    b2d = jnp.tile(bias.astype(jnp.float32), g).reshape(1, Ng)

    # --- Grid: large M tiles; Pallas handles the ragged tail (no pad/slice).
    tm = max(8, _round_up(min(block_rows, _round_up(Mg, 8)), 8))
    grid = (pl.cdiv(Mg, tm),)

    cost = pl.CostEstimate(
        flops=2 * M * C_in * C_out,
        transcendentals=0,
        bytes_accessed=(x2d.size * x2d.dtype.itemsize
                        + w.size * wdt.itemsize
                        + b2d.size * 4
                        + M * C_out * jnp.dtype(out_dtype).itemsize),
    )

    kernel = functools.partial(_linear_kernel, mxu_dtype=wdt)

    # TODO(synk): for very large C_in/C_out (weight approaching VMEM, esp. v7x's
    # 64 MiB) add K/N grid tiling with an f32 VMEM accumulator instead of keeping
    # the full weight block resident.
    out = pl.pallas_call(
        kernel,
        out_shape=jax.ShapeDtypeStruct((Mg, Ng), out_dtype),
        grid_spec=pltpu.PrefetchScalarGridSpec(
            num_scalar_prefetch=0,
            grid=grid,
            in_specs=[
                pl.BlockSpec((tm, Kg), lambda i: (i, 0)),   # streamed x tiles
                pl.BlockSpec((Kg, Ng), lambda i: (0, 0)),   # weight, VMEM-resident
                pl.BlockSpec((1, Ng), lambda i: (0, 0)),    # f32 bias, resident
            ],
            out_specs=pl.BlockSpec((tm, Ng), lambda i: (i, 0)),
        ),
        compiler_params=pltpu.CompilerParams(
            dimension_semantics=("parallel",),  # shards M over v7x's 2 TCs
        ),
        cost_estimate=cost,
    )(x2d, w, b2d)

    # Free row-major reshape back to NHWC.
    return out.reshape(N, H, W, C_out)


def init_params(key, input_dim, output_dim):
    """Matches nn.Conv2d defaults: kaiming_uniform_(a=sqrt(5)) => bound 1/sqrt(fan_in)."""
    kw, kb = jax.random.split(key)
    fan_in = input_dim  # 1x1 kernel
    bound = 1.0 / math.sqrt(fan_in)
    # PyTorch conv weight is (C_out, C_in, 1, 1); we store its transpose (C_in, C_out).
    weight = jax.random.uniform(kw, (input_dim, output_dim), jnp.float32, -bound, bound)
    bias = jax.random.uniform(kb, (output_dim,), jnp.float32, -bound, bound)
    return weight, bias


if __name__ == "__main__":
    key = jax.random.PRNGKey(0)
    k_x, k_p = jax.random.split(key)

    # Module: Linear(input_dim=32, output_dim=16); forward takes NHWC input.
    N, H, W, C_in, C_out = 2, 8, 8, 32, 16
    x = jax.random.normal(k_x, (N, H, W, C_in), dtype=jnp.float32)
    weight, bias = init_params(k_p, C_in, C_out)

    out = jax.block_until_ready(linear_1x1_conv(x, weight, bias))
    assert out.shape == (N, H, W, C_out)
    assert out.dtype == x.dtype

    # Tight check against a reference using the same bf16-quantized operands
    # (the kernel multiplies in bf16 on the MXU but accumulates in f32).
    xs = x.astype(jnp.bfloat16).astype(jnp.float32)
    ws = weight.astype(jnp.bfloat16).astype(jnp.float32)
    ref_q = jnp.einsum("nhwc,cd->nhwd", xs, ws,
                       precision=jax.lax.Precision.HIGHEST) + bias
    assert jnp.allclose(out, ref_q, atol=1e-4, rtol=1e-4)

    # Loose sanity check against the full-f32 reference (bf16 multiply error).
    ref_f32 = jnp.einsum("nhwc,cd->nhwd", x, weight,
                         precision=jax.lax.Precision.HIGHEST) + bias
    assert jnp.allclose(out, ref_f32, atol=5e-2, rtol=5e-2)

    print("KERNEL_OK")
</pallas_src>

<mosaic_0001>
module attributes {stable_mosaic.version = 11 : i64} {
  func.func @_linear_kernel(%arg0: i32, %arg1: memref<16x256xf32, #tpu.memory_space<vmem>>, %arg2: memref<256x128xbf16, #tpu.memory_space<vmem>>, %arg3: memref<1x128xf32, #tpu.memory_space<vmem>>, %arg4: memref<16x128xf32, #tpu.memory_space<vmem>>) attributes {dimension_semantics = [#tpu.dimension_semantics<parallel>], iteration_bounds = array<i64: 1>, scalar_prefetch = 0 : i64, scratch_operands = 0 : i64, tpu.core_type = #tpu.core_type<tc>, window_params = [{transform_indices = @transform_0, window_bounds = array<i64: 16, 256>}, {pipeline_mode = #tpu.pipeline_mode<synchronous>, transform_indices = @transform_1, window_bounds = array<i64: 256, 128>}, {pipeline_mode = #tpu.pipeline_mode<synchronous>, transform_indices = @transform_2, window_bounds = array<i64: 1, 128>}, {transform_indices = @transform_3, window_bounds = array<i64: 16, 128>}]} {
    %c0 = arith.constant 0 : index
    %c0_0 = arith.constant 0 : index
    %0 = vector.load %arg1[%c0, %c0_0] : memref<16x256xf32, #tpu.memory_space<vmem>>, vector<16x256xf32>
    %1 = arith.truncf %0 : vector<16x256xf32> to vector<16x256xbf16>
    %c0_1 = arith.constant 0 : index
    %c0_2 = arith.constant 0 : index
    %2 = vector.load %arg2[%c0_1, %c0_2] : memref<256x128xbf16, #tpu.memory_space<vmem>>, vector<256x128xbf16>
    %cst = arith.constant dense<0.000000e+00> : vector<16x128xf32>
    %3 = tpu.matmul %1, %2, %cst {dimension_numbers = #tpu.dot_dimension_numbers<[1], [0], [0], [1], [0, 0, 1, 1], [], []>} : vector<16x256xbf16>, vector<256x128xbf16>, vector<16x128xf32> -> vector<16x128xf32>
    %c0_3 = arith.constant 0 : index
    %c0_4 = arith.constant 0 : index
    %4 = vector.load %arg3[%c0_3, %c0_4] : memref<1x128xf32, #tpu.memory_space<vmem>>, vector<1x128xf32>
    %5 = vector.broadcast %4 : vector<1x128xf32> to vector<16x128xf32>
    %6 = arith.addf %3, %5 : vector<16x128xf32>
    %c0_5 = arith.constant 0 : index
    %c0_6 = arith.constant 0 : index
    %7 = vector.load %arg4[%c0_5, %c0_6] : memref<16x128xf32, #tpu.memory_space<vmem>>, vector<16x128xf32>
    tpu.vector_store %arg4[%c0_5, %c0_6], %6 {strides = array<i32>} : memref<16x128xf32, #tpu.memory_space<vmem>>, vector<16x128xf32>,
    return
  }
  func.func @transform_0(%arg0: i32) -> (i32, i32) {
    %c0_i32 = arith.constant 0 : i32
    %c0_i32_0 = arith.constant 0 : i32
    return %arg0, %c0_i32 : i32, i32
  }
  func.func @transform_1(%arg0: i32) -> (i32, i32) {
    %c0_i32 = arith.constant 0 : i32
    %c0_i32_0 = arith.constant 0 : i32
    %c0_i32_1 = arith.constant 0 : i32
    return %c0_i32, %c0_i32_0 : i32, i32
  }
  func.func @transform_2(%arg0: i32) -> (i32, i32) {
    %c0_i32 = arith.constant 0 : i32
    %c0_i32_0 = arith.constant 0 : i32
    %c0_i32_1 = arith.constant 0 : i32
    return %c0_i32, %c0_i32_0 : i32, i32
  }
  func.func @transform_3(%arg0: i32) -> (i32, i32) {
    %c0_i32 = arith.constant 0 : i32
    %c0_i32_0 = arith.constant 0 : i32
    return %arg0, %c0_i32 : i32, i32
  }
}

</mosaic_0001>

<bundles_post_ra>
// kernel: tpu_custom_call.1
= control target key start
LH: loop header
LB: loop body
LE: loop exit
PB: predicated region body
PF: predicated region fallthrough
CT: control target
= control target key end

     0   :  { %8 = vsyncpa [#allocation3], 0  ;;  %s450_s0 = inlined_call_operand.hbm [shape: f32[16,256], index: 0, kind: input, shape index: {}]   ;;  %s451_s1 = inlined_call_operand.hbm [shape: bf16[256,128], index: 1, kind: input, shape index: {}]   ;;  %s452_s2 = inlined_call_operand.vmem [shape: f32[1,128], index: 2, kind: input, shape index: {}]   ;;  %s453_s3 = inlined_call_operand.hbm [shape: f32[16,128], index: 3, kind: output, shape index: {}]  }
   0x1   :  { %9 = vsyncpa [#allocation6], 0 }
   0x2   :  { %10 = vsyncpa [#allocation4], 0  ;;  %s382_s12 = smov [#allocation2]   ;;  %s310_s16 = scalar_lea.hbm %s450_s0, 512 }
   0x3   :  { %s16_s13 = sshll.u32 %s382_s12, 4  ;;  %p311_p0 = scmp.ne.s32.totalorder %s450_s0, %s310_s16  ;;  %s17_s13 = int_to_ptr.vmem [resolvable:$true] %s16_s13 }
   0x4   :  { %p314_p1 = scmp.lt.u32.totalorder %s310_s16, %s450_s0 }
   0x6   :  { %p316_p2 = pnand %p314_p1, %p311_p0 }
   0x8   :  { %319 = shalt.err (!%p316_p2)
}
   0x9   :  { %s320_s21 = scalar_lea.vmem %s17_s13, 512  ;;  %p325_p4 = scmp.lt.s32.totalorder %s17_s13, %s17_s13 }
   0xa   :  { %p321_p3 = scmp.ne.s32.totalorder %s17_s13, %s320_s21  ;;  %p326_p5 = scmp.lt.s32.totalorder %s320_s21, %s320_s21 }
   0xc   :  { %p327_p6 = por %p326_p5, %p325_p4 }
   0xe   :  { %p328_p7 = pnand %p327_p6, %p321_p3 }
  0x10   :  { %331 = shalt.err (!%p328_p7)
}
  0x11   :  { %s383_s22 = smov 256   ;;  %s384_s23 = smov 16  }
  0x12   :  { %22 = dma.hbm_to_vmem [thread:$0]  %s450_s0, 512, %s17_s13, [#allocation3], %s383_s22, %s383_s22, %s384_s23  }
  0x13   :  { %s385_s26 = smov [#allocation5]   ;;  %s332_s30 = scalar_lea.hbm %s451_s1, 2048 }
  0x14   :  { %s28_s27 = sshll.u32 %s385_s26, 4  ;;  %p333_p8 = scmp.ne.s32.totalorder %s451_s1, %s332_s30  ;;  %s29_s27 = int_to_ptr.vmem [resolvable:$true] %s28_s27 }
  0x15   :  { %p336_p9 = scmp.lt.u32.totalorder %s332_s30, %s451_s1 }
  0x17   :  { %p338_p10 = pnand %p336_p9, %p333_p8 }
  0x19   :  { %341 = shalt.err (!%p338_p10)
}
  0x1a   :  { %s342_s8 = scalar_lea.vmem %s29_s27, 2048  ;;  %p347_p12 = scmp.lt.s32.totalorder %s29_s27, %s29_s27 }
  0x1b   :  { %p343_p11 = scmp.ne.s32.totalorder %s29_s27, %s342_s8  ;;  %p348_p13 = scmp.lt.s32.totalorder %s342_s8, %s342_s8 }
  0x1d   :  { %p349_p0 = por %p348_p13, %p347_p12 }
  0x1f   :  { %p350_p1 = pnand %p349_p0, %p343_p11 }
  0x21   :  { %353 = shalt.err (!%p350_p1)
}
  0x22   :  { %s386_s0 = smov 64   ;;  %s387_s9 = smov 4  }
  0x23   :  { %34 = dma.hbm_to_vmem [thread:$0]  %s451_s1, 2048, %s29_s27, [#allocation6], %s386_s0, %s386_s0, %s387_s9  }
  0x24   :  { %376 = dma.done.wait [#allocation3], 512  }
  0x25   :  { %377 = vsyncadd [#allocation3], 4294966784 }
  0x26   :  { %378 = dma.done.wait [#allocation6], 2048  }
  0x27   :  { %379 = vsyncadd [#allocation6], 4294965248  ;;  %v294_v0 = vld [vmem:[#allocation5 + $0x40] sm:$0xff]   ;;  %v296_v2 = vld [vmem:[#allocation5 + $0x48] sm:$0xff]   ;;  %s388_s13 = smov [#allocation7]  }
  0x28   :  { %v295_v1 = vld [vmem:[#allocation5] sm:$0xff]   ;;  %263 = vmatprep.subr.bf16.mxu0 %v294_v0  ;;  %v297_v3 = vld [vmem:[#allocation5 + $0x8] sm:$0xff]   ;;  %v298_v4 = vld [vmem:[#allocation5 + $0x50] sm:$0xff]   ;;  %s233_s14 = sshll.u32 %s388_s13, 4  ;;  %s234_s14 = int_to_ptr.vmem [resolvable:$true] %s233_s14 }
  0x29   :  { %264 = vmatpush3.bf16.msra.mxu0 %v295_v1  ;;  %v299_v5 = vld [vmem:[#allocation5 + $0x10] sm:$0xff]   ;;  %v300_v6 = vld [vmem:[#allocation5 + $0x58] sm:$0xff]   ;;  %v302_v8 = vld [vmem:[#allocation5 + $0x60] sm:$0xff]   ;;  %s354_s15 = scalar_lea.vmem %s234_s14, 256  ;;  %p359_p3 = scmp.lt.s32.totalorder %s234_s14, %s234_s14 }
  0x2a   :  { %265 = vmatprep.subr.bf16.mxu0 %v296_v2  ;;  %v301_v7 = vld [vmem:[#allocation5 + $0x18] sm:$0xff]   ;;  %v303_v9 = vld [vmem:[#allocation5 + $0x20] sm:$0xff]   ;;  %v304_v10 = vld [vmem:[#allocation5 + $0x68] sm:$0xff]   ;;  %p355_p2 = scmp.ne.s32.totalorder %s234_s14, %s354_s15  ;;  %p360_p4 = scmp.lt.s32.totalorder %s354_s15, %s354_s15 }
  0x2b   :  { %v45_v11 = vld [vmem:[#allocation2 + $0x8] sm:$0xff]  ;;  %v47_v12 = vld [vmem:[#allocation2 + $0x18] sm:$0xff]  ;;  %v306_v15 = vld [vmem:[#allocation5 + $0x70] sm:$0xff]  }
  0x2c   :  { %v49_v13 = vpack.c.bf16 %v47_v12, %v45_v11  ;;  %v305_v14 = vld [vmem:[#allocation5 + $0x28] sm:$0xff]   ;;  %v307_v16 = vld [vmem:[#allocation5 + $0x30] sm:$0xff]   ;;  %v308_v17 = vld [vmem:[#allocation5 + $0x78] sm:$0xff]   ;;  %p361_p5 = por %p360_p4, %p359_p3 }
  0x2d   :  { %266 = vmatpush3.bf16.msra.mxu0 %v297_v3  ;;  %v309_v18 = vld [vmem:[#allocation5 + $0x38] sm:$0xff]   ;;  %v44_v19 = vld [vmem:[#allocation2] sm:$0xff]  ;;  %v46_v20 = vld [vmem:[#allocation2 + $0x10] sm:$0xff] }
  0x2e   :  { %267 = vmatprep.subr.bf16.mxu0 %v298_v4  ;;  %217 = vmatprep.mubr.bf16.mxu0 %v49_v13  ;;  %v48_v21 = vpack.c.bf16 %v46_v20, %v44_v19  ;;  %v246_v23 = vld [vmem:[%s452_s2] ss:$0 sm:$0xff]  ;;  %p362_p6 = pnand %p361_p5, %p355_p2 }
  0x31   :  { %268 = vmatpush3.bf16.msra.mxu0 %v299_v5 }
  0x32   :  { %269 = vmatprep.subr.bf16.mxu0 %v300_v6 }
  0x35   :  { %270 = vmatpush3.bf16.msra.mxu0 %v301_v7 }
  0x36   :  { %271 = vmatprep.subr.bf16.mxu0 %v302_v8 }
  0x39   :  { %272 = vmatpush3.bf16.msra.mxu0 %v303_v9 }
  0x3a   :  { %273 = vmatprep.subr.bf16.mxu0 %v304_v10 }
  0x3d   :  { %274 = vmatpush3.bf16.msra.mxu0 %v305_v14 }
  0x3e   :  { %275 = vmatprep.subr.bf16.mxu0 %v306_v15 }
  0x41   :  { %276 = vmatpush3.bf16.msra.mxu0 %v307_v16 }
  0x42   :  { %277 = vmatprep.subr.bf16.mxu0 %v308_v17 }
  0x45   :  { %278 = vmatpush3.bf16.msra.mxu0 %v309_v18 }
  0x48   :  { %218 = vmatmul.mubr.bf16.vlgmr.msra.gmra.mrb[0].mxu0 %v48_v21 }
 0x11b   :  { %v279_v22 = vpop.f32.mrb[0].mxu0 }
 0x11c   :  { %v280_v24 = vpop.f32.mrb[1].mxu0 }
 0x11d   :  { %v281_v25 = vadd.f32 %v280_v24, %v279_v22  ;;  %v282_v26 = vpop.f32.mrb[2].mxu0 }
 0x11e   :  { %v283_v27 = vpop.f32.mrb[3].mxu0 }
 0x11f   :  { %v220_v28 = vadd.f32 %v281_v25, %v246_v23  ;;  %v284_v29 = vadd.f32 %v283_v27, %v282_v26 }
 0x121   :  { %226 = vst [vmem:[#allocation7] sm:$0xff] %v220_v28  ;;  %v223_v30 = vadd.f32 %v284_v29, %v246_v23 }
 0x123   :  { %227 = vst [vmem:[#allocation7 + $0x8] sm:$0xff] %v223_v30 }
 0x124   :  { %365 = shalt.err (!%p362_p6)
}
 0x125   :  { %s366_s17 = scalar_lea.hbm %s453_s3, 256 }
 0x126   :  { %p367_p7 = scmp.ne.s32.totalorder %s453_s3, %s366_s17  ;;  %p370_p8 = scmp.lt.u32.totalorder %s366_s17, %s453_s3 }
 0x128   :  { %p372_p9 = pnand %p370_p8, %p367_p7 }
 0x12a   :  { %375 = shalt.err (!%p372_p9)
}
 0x12b   :  { %s389_s22 = smov 128   ;;  %s390_s23 = smov 8  }
 0x12c   :  { %239 = dma.vmem_to_hbm [thread:$0]  %s234_s14, 256, %s453_s3, [#allocation4], %s389_s22, %s389_s22, %s390_s23  }
 0x12d   :  { %380 = dma.done.wait [#allocation4], 256  }
 0x12e   :  { %381 = vsyncadd [#allocation4], 4294967040 }
 0x12f   :  { %243 = vsyncpa [#allocation3], 1 }
 0x130   :  { %244 = vsyncpa [#allocation6], 1 }
 0x131   :  { %245 = vsyncpa [#allocation4], 1 }

</bundles_post_ra>
